<compile_context>
chip_gen: v5e
topology: v5e:2x2
jax: 0.10.0
libtpu: 0.0.40
codegen_flags: <defaults>
</compile_context>

<pallas_src>
import functools

import jax
import jax.numpy as jnp
import numpy as np
from jax import lax
from jax.experimental import pallas as pl
from jax.experimental.pallas import tpu as pltpu


def _instance_loss_kernel(z_row_ref, z_pos_ref, zt_hbm_ref, loss_ref,
                          zt_vmem, acc_ref, *, n_pos, tm, inv_temperature):
    """One block of TM rows against all M columns.

    z_row_ref : (TM, D) f32   rows of this block (auto-pipelined)
    z_pos_ref : (TM, D) f32   partner rows, partner(g) = (g + n_pos) mod M
    zt_hbm_ref: (D, M)        raw HBM ref (pl.ANY), bf16/f32 resident RHS
    loss_ref  : (1, 1)  f32   scalar output (written on the last grid step)
    zt_vmem   : (D, M)        VMEM scratch holding the resident RHS (copied once)
    acc_ref   : (1, 1)  f32   VMEM accumulator scratch
    """
    i = pl.program_id(0)

    @pl.when(i == 0)
    def _init():
        acc_ref[...] = jnp.zeros_like(acc_ref)
        # Resident RHS: copied HBM -> VMEM exactly once, single-buffered.
        pltpu.sync_copy(zt_hbm_ref, zt_vmem)

    inv_t = jnp.float32(inv_temperature)
    # Fold 1/temperature into the row block once (O(TM*D) instead of O(M^2)).
    z_row = z_row_ref[...] * inv_t                                    # (TM, D) f32

    # Positive for global row g = i*TM + r is <z_g, z_partner(g)> / T, computed as
    # a row-wise f32 VPU dot (O(TM*D)) -- no O(TM*M) mask/reduce on the sim slab.
    positives = jnp.sum(z_row * z_pos_ref[...], axis=-1, keepdims=True)  # (TM, 1)

    # MXU matmul: (TM, D) x (D, M) -> (TM, M).  RHS is pre-transposed/cast in the
    # wrapper, so this is the canonical contraction (no per-step transpose/cast).
    lhs = z_row.astype(zt_vmem.dtype)
    sim = lax.dot_general(
        lhs, zt_vmem[...],
        dimension_numbers=(((1,), (0,)), ((), ())),
        preferred_element_type=jnp.float32,
    )                                                                  # (TM, M) f32

    # Exclude only the self-similarity (global diagonal): one (TM, M) iota,
    # one (TM, 1) iota, one compare, one select.
    col_ids = lax.broadcasted_iota(jnp.int32, sim.shape, 1)            # (TM, M)
    row_ids = lax.broadcasted_iota(jnp.int32, (tm, 1), 0) + i * tm     # (TM, 1)
    masked = jnp.where(col_ids == row_ids, jnp.float32(-1e30), sim)

    row_max = jnp.max(masked, axis=1, keepdims=True)                   # (TM, 1)
    sum_exp = jnp.sum(jnp.exp(masked - row_max), axis=1, keepdims=True)
    lse = jnp.log(sum_exp) + row_max                                   # (TM, 1)

    acc_ref[...] += jnp.sum(lse - positives, axis=0, keepdims=True)    # (1, 1)

    @pl.when(i == pl.num_programs(0) - 1)
    def _finalize():
        loss_ref[...] = acc_ref[...] / jnp.float32(n_pos)


def instance_batch_loss(z_i, z_j, batch_size, temperature, *,
                        tm_cap=256, use_bf16_matmul=True):
    """NT-Xent instance loss matching Instance_bantch.forward(z_i, z_j)."""
    z = jnp.concatenate([z_i, z_j], axis=0).astype(jnp.float32)        # (M, D) f32
    M, D = z.shape
    n_pos = 2 * batch_size
    assert M == 2 * n_pos, "z_i and z_j must each have 2*batch_size rows"

    # Resident RHS: transpose + (optional) bf16 cast ONCE in the wrapper.
    rhs_dtype = jnp.bfloat16 if use_bf16_matmul else jnp.float32
    zt = z.T.astype(rhs_dtype)                                         # (D, M)

    # Generation-aware VMEM budget / tile cap (v5e/v6e ~128 MiB, v7x ~64 MiB).
    try:
        vmem_cap = int(getattr(pltpu.get_tpu_info(), "vmem_capacity_bytes",
                               64 * 1024 * 1024))
    except Exception:  # pragma: no cover - conservative fallback
        vmem_cap = 64 * 1024 * 1024
    tm_cap_eff = min(tm_cap, 256 if vmem_cap >= (96 << 20) else 128)

    # Largest row tile <= tm_cap_eff that divides n_pos and is a multiple of 8
    # (f32 sublane).  TM | n_pos guarantees the partner-block index_map trick works.
    tm = None
    for cand in range(min(tm_cap_eff, n_pos), 7, -1):
        if cand % 8 == 0 and n_pos % cand == 0:
            tm = cand
            break

    if tm is not None:
        num_blocks = M // tm
        shift_blocks = n_pos // tm
        z_pos_in = z
        pos_spec = pl.BlockSpec(
            (tm, D), lambda i, s=shift_blocks, nb=num_blocks: ((i + s) % nb, 0))
    else:
        # Tiny / irregular case: single block covering all rows; partner rows are
        # pre-rolled in plain JAX so the kernel body is identical.
        tm = M
        num_blocks = 1
        z_pos_in = jnp.roll(z, shift=-n_pos, axis=0)
        pos_spec = pl.BlockSpec((tm, D), lambda i: (i, 0))

    kernel = functools.partial(
        _instance_loss_kernel,
        n_pos=n_pos,
        tm=tm,
        inv_temperature=1.0 / float(temperature),
    )

    rhs_bytes = 2 if use_bf16_matmul else 4
    # VMEM: single-buffered resident RHS + double-buffered row/partner blocks +
    # a few (TM, M) f32 temporaries + slack.
    vmem_needed = (M * D * rhs_bytes
                   + 2 * 2 * tm * D * 4
                   + 6 * tm * M * 4
                   + (2 << 20))
    vmem_limit = int(min(max(vmem_needed, 32 << 20),
                         max(vmem_cap - (4 << 20), 32 << 20)))

    cost = pl.CostEstimate(
        flops=2 * M * M * D + 8 * M * M,
        transcendentals=M * M,
        bytes_accessed=4 * 2 * M * D + rhs_bytes * M * D + 4,
    )

    out = pl.pallas_call(
        kernel,
        grid=(num_blocks,),
        in_specs=[
            pl.BlockSpec((tm, D), lambda i: (i, 0)),      # row block (pipelined)
            pos_spec,                                      # partner block (pipelined)
            pl.BlockSpec(memory_space=pl.ANY),             # resident RHS, raw HBM ref
        ],
        out_specs=pl.BlockSpec((1, 1), lambda i: (0, 0)),
        out_shape=jax.ShapeDtypeStruct((1, 1), jnp.float32),
        scratch_shapes=[
            pltpu.VMEM((D, M), rhs_dtype),                 # single-buffered RHS
            pltpu.VMEM((1, 1), jnp.float32),               # loss accumulator
        ],
        compiler_params=pltpu.CompilerParams(
            dimension_semantics=("arbitrary",),            # accumulates into one output
            vmem_limit_bytes=vmem_limit,
        ),
        cost_estimate=cost,
    )(z, z_pos_in, zt)
    return out[0, 0]


def reference_loss_numpy(z_i, z_j, batch_size, temperature):
    """Direct transcription of the PyTorch forward (float64, for verification)."""
    N = 2 * batch_size
    z = np.concatenate([np.asarray(z_i), np.asarray(z_j)], axis=0).astype(np.float64)
    sim = (z @ z.T) / temperature
    sim_i_j = np.diagonal(sim, offset=N)
    sim_j_i = np.diagonal(sim, offset=N)  # same offset, as in the original code
    positives = np.concatenate([sim_i_j, sim_j_i]).reshape(2 * N, 1)
    M = 2 * N
    mask = np.ones((M, M), dtype=bool)
    np.fill_diagonal(mask, False)
    for i in range(N):
        mask[i, N + i] = False
        mask[N + i, i] = False
    negatives = sim[mask].reshape(M, M - 2)
    logits = np.concatenate([positives, negatives], axis=1)
    m = logits.max(axis=1, keepdims=True)
    lse = np.log(np.exp(logits - m).sum(axis=1)) + m.squeeze(1)
    return float((lse - logits[:, 0]).sum() / N)


if __name__ == "__main__":
    batch_size = 8          # z_i, z_j have 2*batch_size = 16 rows each
    temperature = 0.5
    D = 128

    key = jax.random.PRNGKey(0)
    k1, k2 = jax.random.split(key)
    z_i = jax.random.normal(k1, (2 * batch_size, D), dtype=jnp.float32)
    z_j = jax.random.normal(k2, (2 * batch_size, D), dtype=jnp.float32)
    # L2-normalized projections (standard NT-Xent inputs; also keeps bf16 MXU
    # operand rounding well inside tolerance).
    z_i = z_i / jnp.linalg.norm(z_i, axis=-1, keepdims=True)
    z_j = z_j / jnp.linalg.norm(z_j, axis=-1, keepdims=True)

    ref = reference_loss_numpy(z_i, z_j, batch_size, temperature)

    # f32 MXU path: tight check against the float64 reference.
    loss_f32 = jax.block_until_ready(
        instance_batch_loss(z_i, z_j, batch_size, temperature, use_bf16_matmul=False))
    assert np.isclose(float(loss_f32), ref, rtol=1e-4, atol=1e-4), (float(loss_f32), ref)

    # Default (bf16 MXU operands, f32 accumulation / softmax): looser tolerance.
    loss_bf16 = jax.block_until_ready(
        instance_batch_loss(z_i, z_j, batch_size, temperature))
    assert np.isclose(float(loss_bf16), ref, rtol=3e-2, atol=3e-2), (float(loss_bf16), ref)

    print("KERNEL_OK")
</pallas_src>

<mosaic_0001>
module attributes {stable_mosaic.version = 11 : i64} {
  func.func @_instance_loss_kernel(%arg0: i32, %arg1: memref<16x128xf32, #tpu.memory_space<vmem>>, %arg2: memref<16x128xf32, #tpu.memory_space<vmem>>, %arg3: memref<128x32xf32, #tpu.memory_space<any>>, %arg4: memref<1x1xf32, #tpu.memory_space<vmem>>, %arg5: memref<128x32xf32, #tpu.memory_space<vmem>>, %arg6: memref<1x1xf32, #tpu.memory_space<vmem>>) attributes {dimension_semantics = [#tpu.dimension_semantics<arbitrary>], iteration_bounds = array<i64: 2>, scalar_prefetch = 0 : i64, scratch_operands = 2 : i64, tpu.core_type = #tpu.core_type<tc>, window_params = [{transform_indices = @transform_0, window_bounds = array<i64: 16, 128>}, {transform_indices = @transform_1, window_bounds = array<i64: 16, 128>}, {}, {pipeline_mode = #tpu.pipeline_mode<synchronous>, transform_indices = @transform_3, window_bounds = array<i64: 1, 1>}]} {
    %c0_i32 = arith.constant 0 : i32
    %0 = arith.cmpi eq, %arg0, %c0_i32 : i32
    %1 = arith.extui %0 : i1 to i32
    %c0_i32_0 = arith.constant 0 : i32
    %2 = arith.cmpi ne, %1, %c0_i32_0 : i32
    scf.if %2 {
      %cst_17 = arith.constant 0.000000e+00 : f32
      %39 = vector.broadcast %cst_17 : f32 to vector<1x1xf32>
      %c0_18 = arith.constant 0 : index
      %c0_19 = arith.constant 0 : index
      %40 = vector.load %arg6[%c0_18, %c0_19] : memref<1x1xf32, #tpu.memory_space<vmem>>, vector<1x1xf32>
      tpu.vector_store %arg6[%c0_18, %c0_19], %39 {strides = array<i32>} : memref<1x1xf32, #tpu.memory_space<vmem>>, vector<1x1xf32>,
      "tpu.region"() ({
        %41 = tpu.sem_alloc : memref<!tpu.dma_semaphore, #tpu.memory_space<semaphore_mem>>
        tpu.enqueue_dma source(%arg3 : memref<128x32xf32, #tpu.memory_space<any>>) target(%arg5 : memref<128x32xf32, #tpu.memory_space<vmem>>) target_semaphore(%41 : memref<!tpu.dma_semaphore, #tpu.memory_space<semaphore_mem>>)
        tpu.wait_dma2 semaphore(%41 : memref<!tpu.dma_semaphore, #tpu.memory_space<semaphore_mem>>) src(%arg3 : memref<128x32xf32, #tpu.memory_space<any>>) dst(%arg5 : memref<128x32xf32, #tpu.memory_space<vmem>>)
        tpu.yield
      }) : () -> ()
    } else {
    }
    %c0 = arith.constant 0 : index
    %c0_1 = arith.constant 0 : index
    %3 = vector.load %arg1[%c0, %c0_1] : memref<16x128xf32, #tpu.memory_space<vmem>>, vector<16x128xf32>
    %cst = arith.constant 2.000000e+00 : f32
    %4 = vector.broadcast %cst : f32 to vector<16x128xf32>
    %5 = arith.mulf %3, %4 : vector<16x128xf32>
    %c0_2 = arith.constant 0 : index
    %c0_3 = arith.constant 0 : index
    %6 = vector.load %arg2[%c0_2, %c0_3] : memref<16x128xf32, #tpu.memory_space<vmem>>, vector<16x128xf32>
    %7 = arith.mulf %5, %6 : vector<16x128xf32>
    %cst_4 = arith.constant dense<0.000000e+00> : vector<16xf32>
    %8 = vector.multi_reduction <add>, %7, %cst_4 [1] : vector<16x128xf32> to vector<16xf32>
    %9 = vector.shape_cast %8 : vector<16xf32> to vector<16x1xf32>
    %c0_5 = arith.constant 0 : index
    %c0_6 = arith.constant 0 : index
    %10 = vector.load %arg5[%c0_5, %c0_6] : memref<128x32xf32, #tpu.memory_space<vmem>>, vector<128x32xf32>
    %cst_7 = arith.constant dense<0.000000e+00> : vector<16x32xf32>
    %11 = tpu.matmul %5, %10, %cst_7 {dimension_numbers = #tpu.dot_dimension_numbers<[1], [0], [0], [1], [0, 0, 1, 1], [], []>} : vector<16x128xf32>, vector<128x32xf32>, vector<16x32xf32> -> vector<16x32xf32>
    %12 = tpu.iota {dimensions = array<i32: 1>} : vector<16x32xi32>
    %13 = tpu.iota {dimensions = array<i32: 0>} : vector<16x1xi32>
    %c16_i32 = arith.constant 16 : i32
    %14 = arith.muli %arg0, %c16_i32 : i32
    %15 = vector.broadcast %14 : i32 to vector<16x1xi32>
    %16 = arith.addi %13, %15 : vector<16x1xi32>
    %17 = vector.broadcast %16 : vector<16x1xi32> to vector<16x32xi32>
    %18 = arith.cmpi eq, %12, %17 : vector<16x32xi32>
    %cst_8 = arith.constant -1.000000e+30 : f32
    %19 = vector.broadcast %cst_8 : f32 to vector<16x32xf32>
    %20 = arith.select %18, %19, %11 : vector<16x32xi1>, vector<16x32xf32>
    %cst_9 = arith.constant dense<0xFF800000> : vector<16xf32>
    %21 = vector.multi_reduction <maximumf>, %20, %cst_9 [1] : vector<16x32xf32> to vector<16xf32>
    %22 = vector.shape_cast %21 : vector<16xf32> to vector<16x1xf32>
    %23 = vector.broadcast %22 : vector<16x1xf32> to vector<16x32xf32>
    %24 = arith.subf %20, %23 : vector<16x32xf32>
    %25 = math.exp %24 : vector<16x32xf32>
    %cst_10 = arith.constant dense<0.000000e+00> : vector<16xf32>
    %26 = vector.multi_reduction <add>, %25, %cst_10 [1] : vector<16x32xf32> to vector<16xf32>
    %27 = vector.shape_cast %26 : vector<16xf32> to vector<16x1xf32>
    %28 = math.log %27 : vector<16x1xf32>
    %29 = arith.addf %28, %22 : vector<16x1xf32>
    %c0_11 = arith.constant 0 : index
    %c0_12 = arith.constant 0 : index
    %30 = vector.load %arg6[%c0_11, %c0_12] : memref<1x1xf32, #tpu.memory_space<vmem>>, vector<1x1xf32>
    %31 = arith.subf %29, %9 : vector<16x1xf32>
    %cst_13 = arith.constant dense<0.000000e+00> : vector<1xf32>
    %32 = vector.multi_reduction <add>, %31, %cst_13 [0] : vector<16x1xf32> to vector<1xf32>
    %33 = vector.shape_cast %32 : vector<1xf32> to vector<1x1xf32>
    %34 = arith.addf %30, %33 : vector<1x1xf32>
    %c0_14 = arith.constant 0 : index
    %c0_15 = arith.constant 0 : index
    %35 = vector.load %arg6[%c0_14, %c0_15] : memref<1x1xf32, #tpu.memory_space<vmem>>, vector<1x1xf32>
    tpu.vector_store %arg6[%c0_14, %c0_15], %34 {strides = array<i32>} : memref<1x1xf32, #tpu.memory_space<vmem>>, vector<1x1xf32>,
    %c1_i32 = arith.constant 1 : i32
    %36 = arith.cmpi eq, %arg0, %c1_i32 : i32
    %37 = arith.extui %36 : i1 to i32
    %c0_i32_16 = arith.constant 0 : i32
    %38 = arith.cmpi ne, %37, %c0_i32_16 : i32
    scf.if %38 {
      %c0_17 = arith.constant 0 : index
      %c0_18 = arith.constant 0 : index
      %39 = vector.load %arg6[%c0_17, %c0_18] : memref<1x1xf32, #tpu.memory_space<vmem>>, vector<1x1xf32>
      %cst_19 = arith.constant 1.600000e+01 : f32
      %40 = vector.broadcast %cst_19 : f32 to vector<1x1xf32>
      %41 = arith.divf %39, %40 : vector<1x1xf32>
      %c0_20 = arith.constant 0 : index
      %c0_21 = arith.constant 0 : index
      %42 = vector.load %arg4[%c0_20, %c0_21] : memref<1x1xf32, #tpu.memory_space<vmem>>, vector<1x1xf32>
      tpu.vector_store %arg4[%c0_20, %c0_21], %41 {strides = array<i32>} : memref<1x1xf32, #tpu.memory_space<vmem>>, vector<1x1xf32>,
    } else {
    }
    return
  }
  func.func @transform_0(%arg0: i32) -> (i32, i32) {
    %c0_i32 = arith.constant 0 : i32
    %c0_i32_0 = arith.constant 0 : i32
    return %arg0, %c0_i32 : i32, i32
  }
  func.func @transform_1(%arg0: i32) -> (i32, i32) {
    %c1_i32 = arith.constant 1 : i32
    %0 = arith.addi %arg0, %c1_i32 : i32
    %c2_i32 = arith.constant 2 : i32
    %c0_i32 = arith.constant 0 : i32
    %1 = arith.cmpi eq, %c2_i32, %c0_i32 : i32
    %c1_i32_0 = arith.constant 1 : i32
    %2 = arith.select %1, %c1_i32_0, %c2_i32 : i32
    %3 = arith.remsi %0, %2 : i32
    %c0_i32_1 = arith.constant 0 : i32
    %4 = arith.cmpi ne, %3, %c0_i32_1 : i32
    %c0_i32_2 = arith.constant 0 : i32
    %5 = arith.cmpi slt, %3, %c0_i32_2 : i32
    %c0_i32_3 = arith.constant 0 : i32
    %6 = arith.cmpi slt, %2, %c0_i32_3 : i32
    %7 = arith.xori %5, %6 : i1
    %8 = arith.andi %7, %4 : i1
    %9 = arith.addi %3, %2 : i32
    %10 = arith.select %8, %9, %3 : i32
    %c0_i32_4 = arith.constant 0 : i32
    %c0_i32_5 = arith.constant 0 : i32
    return %10, %c0_i32_4 : i32, i32
  }
  func.func @transform_3(%arg0: i32) -> (i32, i32) {
    %c0_i32 = arith.constant 0 : i32
    %c0_i32_0 = arith.constant 0 : i32
    %c0_i32_1 = arith.constant 0 : i32
    return %c0_i32, %c0_i32_0 : i32, i32
  }
}

</mosaic_0001>

<bundles_post_ra>
// kernel: tpu_custom_call.1
= control target key start
LH: loop header
LB: loop body
LE: loop exit
PB: predicated region body
PF: predicated region fallthrough
CT: control target
= control target key end

     0   :  { %8 = vsyncpa [#allocation5], 0  ;;  %s615_s12 = smov 0   ;;  %s705_s0 = inlined_call_operand.vmem [shape: f32[32,128], index: 0, kind: input, shape index: {}]   ;;  %s706_s1 = inlined_call_operand.vmem [shape: f32[32,128], index: 1, kind: input, shape index: {}]   ;;  %s707_s2 = inlined_call_operand.vmem [shape: f32[128,32], index: 2, kind: input, shape index: {}]   ;;  %s708_s3 = inlined_call_operand.hbm [shape: f32[1,1], index: 3, kind: output, shape index: {}]  }
   0x1 LB: > { %s621_s13 = sadd.s32 4294967295, %s590_s12   ;;  %p492_p0 = scmp.ge.s32.totalorder %s590_s12, 1  ;;  %s590_s12 = sphi %s615_s12, %s14_s12  }
   0x2   : > { %p173_p1 = scmp.lt.s32.totalorder %s590_s12, 3 }
   0x4   : > { %p174_p2 = pnand %p492_p0, %p173_p1 }
   0x5   : > { %s493_s14 = sshll.u32 (!%p174_p2), %s621_s13, 1  ;;  %s214_s15 = sadd.s32 (!%p174_p2), 1, %s621_s13 }
   0x6   : > { %177 = sbr.rel (%p174_p2) target bundleno = 513 (0x201), region = 28  ;;  %p209_p3 = scmp.lt.s32.totalorder (!%p174_p2), %s493_s14, 3 }
   0x7   : > { %p215_p4 = scmp.lt.s32.totalorder (!%p174_p2), %s214_s15, 0  ;;  %s216_s16 = ssub.s32 (!%p174_p2), 0, %s214_s15 }
   0x8   : > { %s495_s17 = smin.u32 (!%p174_p2), %s216_s16, %s214_s15  ;;  %p500_p7 = scmp.ne.s32.totalorder (!%p174_p2), %s621_s13, 0 }
   0x9   : > { %s218_s19 = sand.u32 (!%p174_p2), 1, %s495_s17  }
   0xa   : > { %s219_s23 = ssub.s32 (!%p174_p2), 0, %s218_s19 }
   0xb   : > { %s710_s14 = smov (!%p209_p3, %s493_s14), 3  ;;  %s712_s23 = smov (!%p215_p4, %s219_s23), %s218_s19 }
   0xc   : > { %s494_s18 = sshll.u32 %s710_s14, 3  ;;  %p497_p5 = scmp.lt.s32.totalorder %s712_s23, 0 }
   0xd   : > { %s630_s22 = scalar_lea.vmem %s705_s0, %s494_s18  ;;  %s225_s24 = sadd.s32 2, %s712_s23 }
   0xe   : > { %s714_s24 = smov (!%p497_p5, %s225_s24), %s712_s23 }
   0xf   : > { %s498_s25 = sshll.u32 %s714_s24, 1 }
  0x10   : > { %p228_p6 = scmp.lt.s32.totalorder %s498_s25, 3  ;;  %249 = sbr.rel (%p500_p7) target bundleno = 43 (0x2b), region = 32 }
  0x12   : > { %s716_s25 = smov (!%p228_p6, %s498_s25), 3 }
  0x13   : > { %s499_s26 = sshll.u32 %s716_s25, 3 }
  0x14   : > { %s635_s29 = scalar_lea.vmem %s706_s1, %s499_s26 }
  0x15   : > { %vm250_vm0 = vcmask 0   ;;  %v592_v0 = vmov 0.0  }
  0x16   : > { %251 = vst.msk [vmem:[#allocation3] sm:$0x1] %vm250_vm0, %v592_v0 }
  0x17   : > { %v262_v1 = vld [vmem:[%s707_s2] sm:$0xff]  ;;  %v264_v2 = vld [vmem:[%s707_s2 + $0x8] sm:$0xff]  ;;  %v266_v3 = vld [vmem:[%s707_s2 + $0x10] sm:$0xff] }
  0x18   : > { %263 = vst [vmem:[#allocation2 + $0x30] sm:$0xff] %v262_v1  ;;  %v268_v4 = vld [vmem:[%s707_s2 + $0x18] sm:$0xff]  ;;  %v270_v5 = vld [vmem:[%s707_s2 + $0x20] sm:$0xff]  ;;  %v272_v6 = vld [vmem:[%s707_s2 + $0x28] sm:$0xff] }
  0x19   : > { %265 = vst [vmem:[#allocation2] sm:$0xff] %v264_v2  ;;  %v274_v7 = vld [vmem:[%s707_s2 + $0x30] sm:$0xff]  ;;  %v276_v8 = vld [vmem:[%s707_s2 + $0x38] sm:$0xff]  ;;  %v278_v9 = vld [vmem:[%s707_s2 + $0x40] sm:$0xff] }
  0x1a   : > { %267 = vst [vmem:[#allocation2 + $0x58] sm:$0xff] %v266_v3  ;;  %v280_v10 = vld [vmem:[%s707_s2 + $0x48] sm:$0xff]  ;;  %v282_v11 = vld [vmem:[%s707_s2 + $0x50] sm:$0xff]  ;;  %v284_v12 = vld [vmem:[%s707_s2 + $0x58] sm:$0xff] }
  0x1b   : > { %269 = vst [vmem:[#allocation2 + $0x18] sm:$0xff] %v268_v4  ;;  %v286_v13 = vld [vmem:[%s707_s2 + $0x60] sm:$0xff]  ;;  %v288_v14 = vld [vmem:[%s707_s2 + $0x68] sm:$0xff]  ;;  %v290_v15 = vld [vmem:[%s707_s2 + $0x70] sm:$0xff] }
  0x1c   : > { %271 = vst [vmem:[#allocation2 + $0x50] sm:$0xff] %v270_v5  ;;  %v292_v16 = vld [vmem:[%s707_s2 + $0x78] sm:$0xff] }
  0x1d   : > { %273 = vst [vmem:[#allocation2 + $0x68] sm:$0xff] %v272_v6 }
  0x1e   : > { %275 = vst [vmem:[#allocation2 + $0x8] sm:$0xff] %v274_v7 }
  0x1f   : > { %277 = vst [vmem:[#allocation2 + $0x48] sm:$0xff] %v276_v8 }
  0x20   : > { %279 = vst [vmem:[#allocation2 + $0x40] sm:$0xff] %v278_v9 }
  0x21   : > { %281 = vst [vmem:[#allocation2 + $0x20] sm:$0xff] %v280_v10 }
  0x22   : > { %283 = vst [vmem:[#allocation2 + $0x10] sm:$0xff] %v282_v11 }
  0x23   : > { %285 = vst [vmem:[#allocation2 + $0x38] sm:$0xff] %v284_v12 }
  0x24   : > { %287 = vst [vmem:[#allocation2 + $0x60] sm:$0xff] %v286_v13 }
  0x25   : > { %289 = vst [vmem:[#allocation2 + $0x70] sm:$0xff] %v288_v14 }
  0x26   : > { %291 = vst [vmem:[#allocation2 + $0x78] sm:$0xff] %v290_v15 }
  0x27   : > { %293 = vst [vmem:[#allocation2 + $0x28] sm:$0xff] %v292_v16 }
  0x28   : > { %299 = vsyncadd [#allocation6], 2048 }
  0x29   : > { %582 = dma.done.wait [#allocation6], 2048 }
  0x2a   : > { %583 = vsyncadd [#allocation6], 4294965248 }
  0x2b PF: > { %v327_v20 = vld [vmem:[#allocation2 + $0x60] sm:$0xff]  ;;  %v326_v21 = vld [vmem:[#allocation2 + $0x38] sm:$0xff]  ;;  %v325_v22 = vld [vmem:[#allocation2 + $0x10] sm:$0xff]  ;;  %v354_v37 = vlaneseq  ;;  %s501_s14 = sshll.u32 %s621_s13, 4  ;;  %vm367_vm2 = vcmask 261120   ;;  %vm403_vm4 = vcmask 0  }
  0x2c   : > { %v328_v19 = vld [vmem:[#allocation2 + $0x70] sm:$0xff]  ;;  %v324_v23 = vld [vmem:[#allocation2 + $0x20] sm:$0xff]  ;;  %v322_v25 = vld [vmem:[#allocation2 + $0x48] sm:$0xff]  ;;  %v360_v39 = vstv %s501_s14  ;;  %p502_p8 = scmp.ne.s32.totalorder %s621_s13, 1 }
  0x2d   : > { %v329_v18 = vld [vmem:[#allocation2 + $0x78] sm:$0xff]  ;;  %v323_v24 = vld [vmem:[#allocation2 + $0x40] sm:$0xff]  ;;  %v321_v26 = vld [vmem:[#allocation2 + $0x8] sm:$0xff]  ;;  %v357_v38 = vshrl.u32 %v354_v37, 7  ;;  %v355_v40 = vand.u32 127, %v354_v37 }
  0x2e   : > { %v330_v17 = vld [vmem:[#allocation2 + $0x28] sm:$0xff]  ;;  %v319_v28 = vld [vmem:[#allocation2 + $0x50] sm:$0xff]  ;;  %v318_v29 = vld [vmem:[#allocation2 + $0x18] sm:$0xff] }
  0x2f   : > { %331 = vmatpush.msra.mxu0 %v330_v17  ;;  %507 = vmatpush.msra.mxu1 %v330_v17  ;;  %v320_v27 = vld [vmem:[#allocation2 + $0x68] sm:$0xff]  ;;  %v317_v30 = vld [vmem:[#allocation2 + $0x58] sm:$0xff]  ;;  %v303_v31 = vld [vmem:[%s630_s22] sm:$0xff]  ;;  %v361_v41 = vadd.s32 %v360_v39, %v357_v38  ;;  %v358_v42 = vadd.s32 8, %v357_v38 }
  0x30   : > { %v304_v32 = vld [vmem:[%s630_s22 + $0x8] sm:$0xff]  ;;  %v316_v33 = vld [vmem:[#allocation2] sm:$0xff]  ;;  %v315_v34 = vld [vmem:[#allocation2 + $0x30] sm:$0xff]  ;;  %v305_v35 = vmul.f32 2.0, %v303_v31 }
  0x31   : > { %332 = vmatpush.msra.mxu0 %v329_v18  ;;  %508 = vmatpush.msra.mxu1 %v329_v18  ;;  %v306_v36 = vmul.f32 2.0, %v304_v32  ;;  %vm363_vm1 = vcmp.eq.s32.totalorder %v355_v40, %v361_v41  ;;  %v362_v43 = vadd.s32 %v360_v39, %v358_v42  ;;  %v307_v50 = vld [vmem:[%s635_s29] sm:$0xff]  ;;  %v308_v52 = vld [vmem:[%s635_s29 + $0x8] sm:$0xff] }
  0x32   : > { %v309_v51 = vmul.f32 %v307_v50, %v305_v35  ;;  %v392_v18 = vld [vmem:[#allocation3] sm:$0x1] }
  0x33   : > { %333 = vmatpush.msra.mxu0 %v328_v19  ;;  %509 = vmatpush.msra.mxu1 %v328_v19  ;;  %vm364_vm3 = vcmp.eq.s32.totalorder %v355_v40, %v362_v43  ;;  %v310_v53 = vmul.f32 %v308_v52, %v306_v36 }
  0x34   : > { %311 = vadd.xlane.f32.xlu2 %v309_v51 }
  0x35   : > { %334 = vmatpush.msra.mxu0 %v327_v20  ;;  %510 = vmatpush.msra.mxu1 %v327_v20 }
  0x37   : > { %335 = vmatpush.msra.mxu0 %v326_v21  ;;  %511 = vmatpush.msra.mxu1 %v326_v21 }
  0x39   : > { %336 = vmatpush.msra.mxu0 %v325_v22  ;;  %512 = vmatpush.msra.mxu1 %v325_v22 }
  0x3b   : > { %337 = vmatpush.msra.mxu0 %v324_v23  ;;  %513 = vmatpush.msra.mxu1 %v324_v23 }
  0x3c   : > { %313 = vadd.xlane.f32.xlu2 %v310_v53 }
  0x3d   : > { %338 = vmatpush.msra.mxu0 %v323_v24  ;;  %514 = vmatpush.msra.mxu1 %v323_v24 }
  0x3f   : > { %339 = vmatpush.msra.mxu0 %v322_v25  ;;  %515 = vmatpush.msra.mxu1 %v322_v25 }
  0x41   : > { %340 = vmatpush.msra.mxu0 %v321_v26  ;;  %516 = vmatpush.msra.mxu1 %v321_v26 }
  0x43   : > { %341 = vmatpush.msra.mxu0 %v320_v27  ;;  %517 = vmatpush.msra.mxu1 %v320_v27 }
  0x45   : > { %342 = vmatpush.msra.mxu0 %v319_v28  ;;  %518 = vmatpush.msra.mxu1 %v319_v28 }
  0x47   : > { %343 = vmatpush.msra.mxu0 %v318_v29  ;;  %519 = vmatpush.msra.mxu1 %v318_v29 }
  0x49   : > { %344 = vmatpush.msra.mxu0 %v317_v30  ;;  %520 = vmatpush.msra.mxu1 %v317_v30 }
  0x4b   : > { %345 = vmatpush.msra.mxu0 %v316_v33  ;;  %521 = vmatpush.msra.mxu1 %v316_v33 }
  0x4d   : > { %346 = vmatpush.msra.mxu0 %v315_v34  ;;  %522 = vmatpush.msra.mxu1 %v315_v34 }
  0x4e   : > { %347 = vmatmul.f32.vlgmr.msra.gmra.mxu0 %v305_v35  ;;  %350 = vmatmul.f32.vlgmr.msra.gmra.mxu1 %v306_v36 }
  0xa7   : > { %v312_v1 = vpop.xlane.xlu2 %311 }
  0xaf   : > { %v314_v8 = vpop.xlane.xlu2 %313 }
  0xcb   : > { %v348_v44 = vpop.f32.mrf.mxu0  ;;  %v351_v47 = vpop.f32.mrf.mxu1 }
  0xcc   : > { %v365_v45 = vsel %vm363_vm1, -1e+30, %v348_v44  ;;  %v366_v48 = vsel %vm364_vm3, -1e+30, %v351_v47 }
  0xcd   : > { %v368_v46 = vsel %vm367_vm2, %v365_v45, -inf  ;;  %v371_v49 = vsel %vm367_vm2, %v366_v48, -inf }
  0xce   : > { %369 = vmax.xlane.f32.xlu0 %v368_v46 }
  0xd6   : > { %372 = vmax.xlane.f32.xlu0 %v371_v49 }
 0x141   : > { %v370_v54 = vpop.xlane.xlu0 %369 }
 0x142   : > { %v374_v55 = vsub.f32 %v365_v45, %v370_v54 }
 0x144   : > { %v376_v56 = vmul.f32 1.442695, %v374_v55 }
 0x146   : > { %540 = vpow2.f32 %v376_v56 }
 0x149   : > { %v373_v57 = vpop.xlane.xlu0 %372 }
 0x14a   : > { %v375_v58 = vsub.f32 %v366_v48, %v373_v57 }
 0x14c   : > { %v541_v59 = vpop.eup %540  ;;  %v378_v60 = vmul.f32 1.442695, %v375_v58 }
 0x14d   : > { %v380_v61 = vsel %vm367_vm2, %v541_v59, 0.0 }
 0x14e   : > { %542 = vpow2.f32 %v378_v60  ;;  %381 = vadd.xlane.f32.xlu1 %v380_v61 }
 0x154   : > { %v543_v62 = vpop.eup %542 }
 0x155   : > { %v383_v63 = vsel %vm367_vm2, %v543_v62, 0.0 }
 0x156   : > { %384 = vadd.xlane.f32.xlu1 %v383_v63 }
 0x1c1   : > { %v382_v0 = vpop.xlane.xlu1 %381 }
 0x1c2   : > { %544 = vlog2.f32 %v382_v0 }
 0x1c8   : > { %v545_v3 = vpop.eup %544 }
 0x1c9   : > { %v385_v2 = vpop.xlane.xlu1 %384  ;;  %v387_v4 = vmul.f32 0.6931472, %v545_v3 }
 0x1ca   : > { %546 = vlog2.f32 %v385_v2 }
 0x1cb   : > { %v390_v7 = vadd.f32 %v387_v4, %v370_v54 }
 0x1cd   : > { %v393_v10 = vsub.f32 %v390_v7, %v312_v1 }
 0x1d0   : > { %v547_v5 = vpop.eup %546 }
 0x1d1   : > { %v389_v6 = vmul.f32 0.6931472, %v547_v5 }
 0x1d3   : > { %v391_v9 = vadd.f32 %v389_v6, %v373_v57 }
 0x1d5   : > { %v394_v11 = vsub.f32 %v391_v9, %v314_v8 }
 0x1d7   : > { %v395_v12 = vadd.f32 %v394_v11, %v393_v10 }
 0x1d9   : > { %v396_v13 = vrot.slane %v395_v12, 4 }
 0x1db   : > { %v397_v14 = vadd.f32 %v396_v13, %v395_v12 }
 0x1dd   : > { %v398_v15 = vrot.slane %v397_v14, 2 }
 0x1df   : > { %v399_v16 = vadd.f32 %v398_v15, %v397_v14 }
 0x1e1   : > { %v400_v17 = vrot.slane %v399_v16, 1 }
 0x1e3   : > { %v401_v19 = vadd.f32 %v400_v17, %v399_v16  ;;  %408 = sbr.rel (%p502_p8) target bundleno = 508 (0x1fc), region = 56 }
 0x1e5   : > { %v402_v20 = vadd.f32 %v401_v19, %v392_v18 }
 0x1e7   : > { %404 = vst.msk [vmem:[#allocation3] sm:$0x1] %vm403_vm4, %v402_v20 }
 0x1e8   : > { %v593_v21 = vmov 16.0  }
 0x1e9   : > { %548 = vrcp.f32 %v593_v21 }
 0x1ee   : > { %v409_v26 = vld [vmem:[#allocation3] sm:$0x1] }
 0x1ef   : > { %v549_v22 = vpop.eup %548 }
 0x1f0   : > { %v411_v23 = vmul.f32 16.0, %v549_v22  ;;  %vm415_vm5 = vweird.f32 %v549_v22 }
 0x1f2   : > { %v412_v24 = vsub.f32 1.0, %v411_v23 }
 0x1f4   : > { %v413_v25 = vmul.f32 %v549_v22, %v412_v24 }
 0x1f6   : > { %v414_v27 = vadd.f32 %v549_v22, %v413_v25 }
 0x1f8   : > { %v416_v28 = vsel %vm415_vm5, %v549_v22, %v414_v27 }
 0x1f9   : > { %v417_v29 = vmul.f32 %v416_v28, %v409_v26 }
 0x1fb   : > { %418 = vst.msk [vmem:[#allocation4] sm:$0x1] %vm403_vm4, %v417_v29 }
 0x1fc PF: > { %p527_p9 = scmp.eq.s32.totalorder %s621_s13, 1  ;;  %s594_s22 = smov [#allocation4]  }
 0x1fd   : > { %s425_s29 = sshll.u32 %s594_s22, 4  ;;  %s427_s17 = sshll.u32 %s708_s3, 4  ;;  %s426_s29 = int_to_ptr.vmem [resolvable:$true] %s425_s29  ;;  %s428_s17 = int_to_ptr.hbm [resolvable:$true] %s427_s17 }
 0x1fe   : > { %524 = dma.vmem_to_hbm [thread:$0]  (%p527_p9), %s426_s29, 16, %s428_s17, [#allocation5]  }
 0x1ff   : > { %585 = dma.done.wait (%p527_p9), [#allocation5], 16  }
 0x200   : > { %587 = vsyncadd (%p527_p9), [#allocation5], 4294967280 }
 0x201 PF: > { %s14_s12 = sadd.s32 1, %s590_s12  }
 0x202   : > { %p11_p10 = scmp.ge.s32.totalorder %s14_s12, 4  }
 0x204   :  { %13 = sbr.rel (!%p11_p10) target bundleno = 1 (0x1), region = 90 }
 0x209   :  { %441 = vsyncpa [#allocation5], 1 }
 0x20a   :  { %443 = vsyncpa [#allocation5 + $0x1], 1 }

</bundles_post_ra>
